<compile_context>
chip_gen: v7x
topology: tpu7x:2x2x1
jax: 0.10.0
libtpu: 0.0.40
codegen_flags: <defaults>
</compile_context>

<pallas_src>
import jax
import jax.numpy as jnp
from jax import lax
from jax.experimental import pallas as pl
from jax.experimental.pallas import tpu as pltpu

# ---- model config (small shapes consistent with the module) ----
B         = 8                     # number of graphs (batch)
FEAT      = 8                     # args.features_dim
TR_HIDDEN = 24                    # args.tr_hidden_dim
HID       = TR_HIDDEN + FEAT      # hidden_dim = 32
HEADS     = 4                     # args.tr_head_size
DK        = HID // HEADS          # att_size = 8
FFN       = 64                    # args.tr_ffn_dim
NLAYERS   = 2                     # args.tr_n_layers
LN_EPS    = 1e-5
SCALE     = float(DK) ** -0.5

# ---- packed parameter-slab layout (per layer; all slices lane-0 aligned,
#      weight blocks sublane-8 aligned, param rows form one aligned 8x128 group)
LANES  = 128
R_WVO  = 0                        # rows [0, HID)           lanes [0, HID) : Wv @ Wo
R_W1   = HID                      # rows [HID, 2*HID)       lanes [0, FFN) : FFN layer1 W
R_W2   = 2 * HID                  # rows [2*HID, 2*HID+FFN) lanes [0, HID) : FFN layer2 W
R_PAR  = 2 * HID + FFN            # parameter rows start (= 128)
#   param row offsets (within the 8-row group starting at R_PAR):
#   0: ln1 gamma   1: ln1 beta   2: ln2 gamma   3: ln2 beta
#   4: bv@Wo + bo  5: ffn bias1  6: ffn bias2   7: zero padding
ROWS   = ((R_PAR + 7 + 7) // 8) * 8        # -> 136 (multiple of 8)


def _layer_norm(x, g, b):
    mu = jnp.mean(x, axis=-1, keepdims=True)
    var = jnp.mean(jnp.square(x - mu), axis=-1, keepdims=True)
    return (x - mu) * lax.rsqrt(var + LN_EPS) * g + b


def _gelu_tanh(x):
    # tanh-approx GELU: tanh runs on the EUP (free slot) instead of the long
    # erf polynomial on the VALU; difference vs exact GELU is ~3e-4.
    c = 0.7978845608028654  # sqrt(2/pi)
    return 0.5 * x * (1.0 + jnp.tanh(c * (x + 0.044715 * x * x * x)))


def _gelu_exact(x):
    # nn.GELU() default (exact erf) — used only by the pure-JAX reference.
    return 0.5 * x * (1.0 + lax.erf(x * (2.0 ** -0.5)))


def transformer_fuse_kernel(x_ref, slab_ref, out_ref):
    x = x_ref[...]
    for l in range(NLAYERS):                       # static unroll (NLAYERS == 2)
        # weights: static, lane-0-aligned slices of the packed slab
        w_vo = slab_ref[l, R_WVO:R_WVO + HID, 0:HID]      # [HID, HID]  (Wv @ Wo)
        w1   = slab_ref[l, R_W1:R_W1 + HID, 0:FFN]        # [HID, FFN]
        w2   = slab_ref[l, R_W2:R_W2 + FFN, 0:HID]        # [FFN, HID]
        # all small params in one aligned 8x128 row group
        par  = slab_ref[l, R_PAR:R_PAR + 8, :]            # [8, 128]
        g1, b1ln = par[0:1, :HID], par[1:2, :HID]
        g2, b2ln = par[2:3, :HID], par[3:4, :HID]
        b_vo     = par[4:5, :HID]
        bf1      = par[5:6, :FFN]
        bf2      = par[6:7, :HID]

        # --- self-attention block ---
        # seq length is 1 => softmax over the key axis is identically 1.0 and
        # the context equals V; with Wv@Wo pre-folded the block is one matmul.
        y = _layer_norm(x, g1, b1ln)
        x = x + jnp.dot(y, w_vo, preferred_element_type=jnp.float32) + b_vo
        # (att_dropout / self_attention_dropout are identity in eval mode)

        # --- FFN block ---
        y2 = _layer_norm(x, g2, b2ln)
        h  = _gelu_tanh(jnp.dot(y2, w1, preferred_element_type=jnp.float32) + bf1)
        x  = x + jnp.dot(h, w2, preferred_element_type=jnp.float32) + bf2
        # (ffn_dropout is identity in eval mode)

    out_ref[...] = x


def transformer_fuse(x, feat_bias, slab):
    # `feat_bias` (molecular features -> feature_transfer attention bias) is
    # accepted for interface fidelity with the PyTorch module, but with an
    # implicit sequence length of 1 the softmax over the key axis is 1.0
    # regardless of the bias, so the forward output does not depend on it.
    del feat_bias
    vmem = pl.BlockSpec(memory_space=pltpu.MemorySpace.VMEM)  # whole-array blocks
    return pl.pallas_call(
        transformer_fuse_kernel,
        out_shape=jax.ShapeDtypeStruct((B, HID), jnp.float32),
        in_specs=[vmem, vmem],
        out_specs=vmem,
    )(x, slab)


def init_params(key):
    """PyTorch-like parameters (Linear weights stored transposed: [in, out])."""
    keys = iter(jax.random.split(key, 16))

    def w(shape, scale=0.08):
        return (scale * jax.random.normal(next(keys), shape)).astype(jnp.float32)

    p = {}
    # GraphFormer.feature_transfer: Linear(features_dim, head_size)
    p["wt"] = w((FEAT, HEADS))
    p["bt"] = w((1, HEADS))
    # LayerNorm default init (gamma=1, beta=0), stacked over layers
    p["ln1g"] = jnp.ones((NLAYERS, 1, HID), jnp.float32)
    p["ln1b"] = jnp.zeros((NLAYERS, 1, HID), jnp.float32)
    p["ln2g"] = jnp.ones((NLAYERS, 1, HID), jnp.float32)
    p["ln2b"] = jnp.zeros((NLAYERS, 1, HID), jnp.float32)
    # MultiHeadAttention linears, stacked over layers, stored [in, out]
    p["wq"] = w((NLAYERS, HID, HID)); p["bq"] = w((NLAYERS, 1, HID))
    p["wk"] = w((NLAYERS, HID, HID)); p["bk"] = w((NLAYERS, 1, HID))
    p["wv"] = w((NLAYERS, HID, HID)); p["bv"] = w((NLAYERS, 1, HID))
    p["wo"] = w((NLAYERS, HID, HID)); p["bo"] = w((NLAYERS, 1, HID))
    # FeedForwardNetwork
    p["w1"] = w((NLAYERS, HID, FFN)); p["b1"] = w((NLAYERS, 1, FFN))
    p["w2"] = w((NLAYERS, FFN, HID)); p["b2"] = w((NLAYERS, 1, HID))
    return p


def pack_params(p):
    """Fold Wv@Wo / bv@Wo+bo and pack everything into one lane-dense slab."""
    slab = jnp.zeros((NLAYERS, ROWS, LANES), jnp.float32)
    for l in range(NLAYERS):
        w_vo = p["wv"][l] @ p["wo"][l]                        # [HID, HID]
        b_vo = p["bv"][l] @ p["wo"][l] + p["bo"][l]           # [1, HID]
        slab = slab.at[l, R_WVO:R_WVO + HID, :HID].set(w_vo)
        slab = slab.at[l, R_W1:R_W1 + HID, :FFN].set(p["w1"][l])
        slab = slab.at[l, R_W2:R_W2 + FFN, :HID].set(p["w2"][l])
        slab = slab.at[l, R_PAR + 0, :HID].set(p["ln1g"][l, 0])
        slab = slab.at[l, R_PAR + 1, :HID].set(p["ln1b"][l, 0])
        slab = slab.at[l, R_PAR + 2, :HID].set(p["ln2g"][l, 0])
        slab = slab.at[l, R_PAR + 3, :HID].set(p["ln2b"][l, 0])
        slab = slab.at[l, R_PAR + 4, :HID].set(b_vo[0])
        slab = slab.at[l, R_PAR + 5, :FFN].set(p["b1"][l, 0])
        slab = slab.at[l, R_PAR + 6, :HID].set(p["b2"][l, 0])
    return slab


def reference(x, feat_bias, p):
    """Pure-JAX mirror of the FULL PyTorch forward (eval mode) for validation:
    includes feature_transfer bias, q/k/scores, softmax and exact erf-GELU."""
    attn_bias = feat_bias @ p["wt"] + p["bt"]                   # [B, HEADS]
    for l in range(NLAYERS):
        y = _layer_norm(x, p["ln1g"][l], p["ln1b"][l])
        q = y @ p["wq"][l] + p["bq"][l]
        k = y @ p["wk"][l] + p["bk"][l]
        v = y @ p["wv"][l] + p["bv"][l]
        qh = (q * SCALE).reshape(B, HEADS, DK)
        kh = k.reshape(B, HEADS, DK)
        vh = v.reshape(B, HEADS, DK)
        scores = jnp.einsum("bhd,bhd->bh", qh, kh) + attn_bias  # [B, HEADS]
        probs = jax.nn.softmax(scores[..., None], axis=-1)      # size-1 axis -> ones
        ctx = (probs * vh).reshape(B, HID)
        x = x + ctx @ p["wo"][l] + p["bo"][l]
        y2 = _layer_norm(x, p["ln2g"][l], p["ln2b"][l])
        h1 = _gelu_exact(y2 @ p["w1"][l] + p["b1"][l])
        x = x + h1 @ p["w2"][l] + p["b2"][l]
    return x


if __name__ == "__main__":
    key = jax.random.PRNGKey(0)
    kx, kb, kp = jax.random.split(key, 3)
    output = jax.random.normal(kx, (B, HID), jnp.float32)   # 2-D input, as the module implies
    bias = jax.random.normal(kb, (B, FEAT), jnp.float32)    # molecular features
    params = init_params(kp)
    slab = pack_params(params)

    out = transformer_fuse(output, bias, slab)
    out = jax.block_until_ready(out)

    ref = reference(output, bias, params)
    assert out.shape == (B, HID), out.shape
    assert bool(jnp.allclose(out, ref, atol=2e-2, rtol=2e-2)), \
        float(jnp.max(jnp.abs(out - ref)))
    print("KERNEL_OK")
</pallas_src>

<mosaic_0001>
module attributes {stable_mosaic.version = 11 : i64} {
  func.func @transformer_fuse_kernel(%arg0: memref<8x32xf32, #tpu.memory_space<vmem>>, %arg1: memref<2x136x128xf32, #tpu.memory_space<vmem>>, %arg2: memref<8x32xf32, #tpu.memory_space<vmem>>) attributes {dimension_semantics = [], scalar_prefetch = 0 : i64, scratch_operands = 0 : i64, tpu.core_type = #tpu.core_type<tc>} {
    %c0 = arith.constant 0 : index
    %c0_0 = arith.constant 0 : index
    %0 = vector.load %arg0[%c0, %c0_0] : memref<8x32xf32, #tpu.memory_space<vmem>>, vector<8x32xf32>
    %c0_1 = arith.constant 0 : index
    %c0_2 = arith.constant 0 : index
    %c0_3 = arith.constant 0 : index
    %1 = vector.load %arg1[%c0_1, %c0_2, %c0_3] : memref<2x136x128xf32, #tpu.memory_space<vmem>>, vector<1x32x32xf32>
    %2 = vector.shape_cast %1 : vector<1x32x32xf32> to vector<32x32xf32>
    %c0_4 = arith.constant 0 : index
    %c32 = arith.constant 32 : index
    %c0_5 = arith.constant 0 : index
    %3 = vector.load %arg1[%c0_4, %c32, %c0_5] : memref<2x136x128xf32, #tpu.memory_space<vmem>>, vector<1x32x64xf32>
    %4 = vector.shape_cast %3 : vector<1x32x64xf32> to vector<32x64xf32>
    %c0_6 = arith.constant 0 : index
    %c64 = arith.constant 64 : index
    %c0_7 = arith.constant 0 : index
    %5 = vector.load %arg1[%c0_6, %c64, %c0_7] : memref<2x136x128xf32, #tpu.memory_space<vmem>>, vector<1x64x32xf32>
    %6 = vector.shape_cast %5 : vector<1x64x32xf32> to vector<64x32xf32>
    %c0_8 = arith.constant 0 : index
    %c128 = arith.constant 128 : index
    %c0_9 = arith.constant 0 : index
    %7 = vector.load %arg1[%c0_8, %c128, %c0_9] : memref<2x136x128xf32, #tpu.memory_space<vmem>>, vector<1x8x128xf32>
    %8 = vector.shape_cast %7 : vector<1x8x128xf32> to vector<8x128xf32>
    %9 = vector.extract_strided_slice %8 {offsets = [0, 0], sizes = [1, 32], strides = [1, 1]} : vector<8x128xf32> to vector<1x32xf32>
    %10 = vector.extract_strided_slice %8 {offsets = [1, 0], sizes = [1, 32], strides = [1, 1]} : vector<8x128xf32> to vector<1x32xf32>
    %11 = vector.extract_strided_slice %8 {offsets = [2, 0], sizes = [1, 32], strides = [1, 1]} : vector<8x128xf32> to vector<1x32xf32>
    %12 = vector.extract_strided_slice %8 {offsets = [3, 0], sizes = [1, 32], strides = [1, 1]} : vector<8x128xf32> to vector<1x32xf32>
    %13 = vector.extract_strided_slice %8 {offsets = [4, 0], sizes = [1, 32], strides = [1, 1]} : vector<8x128xf32> to vector<1x32xf32>
    %14 = vector.extract_strided_slice %8 {offsets = [5, 0], sizes = [1, 64], strides = [1, 1]} : vector<8x128xf32> to vector<1x64xf32>
    %15 = vector.extract_strided_slice %8 {offsets = [6, 0], sizes = [1, 32], strides = [1, 1]} : vector<8x128xf32> to vector<1x32xf32>
    %cst = arith.constant dense<0.000000e+00> : vector<8xf32>
    %16 = vector.multi_reduction <add>, %0, %cst [1] : vector<8x32xf32> to vector<8xf32>
    %17 = vector.shape_cast %16 : vector<8xf32> to vector<8x1xf32>
    %cst_10 = arith.constant 3.200000e+01 : f32
    %18 = vector.broadcast %cst_10 : f32 to vector<8x1xf32>
    %19 = arith.divf %17, %18 : vector<8x1xf32>
    %20 = vector.broadcast %19 : vector<8x1xf32> to vector<8x32xf32>
    %21 = arith.subf %0, %20 : vector<8x32xf32>
    %22 = arith.mulf %21, %21 : vector<8x32xf32>
    %cst_11 = arith.constant dense<0.000000e+00> : vector<8xf32>
    %23 = vector.multi_reduction <add>, %22, %cst_11 [1] : vector<8x32xf32> to vector<8xf32>
    %24 = vector.shape_cast %23 : vector<8xf32> to vector<8x1xf32>
    %cst_12 = arith.constant 3.200000e+01 : f32
    %25 = vector.broadcast %cst_12 : f32 to vector<8x1xf32>
    %26 = arith.divf %24, %25 : vector<8x1xf32>
    %27 = vector.broadcast %19 : vector<8x1xf32> to vector<8x32xf32>
    %28 = arith.subf %0, %27 : vector<8x32xf32>
    %cst_13 = arith.constant 9.99999974E-6 : f32
    %29 = vector.broadcast %cst_13 : f32 to vector<8x1xf32>
    %30 = arith.addf %26, %29 : vector<8x1xf32>
    %31 = math.rsqrt %30 : vector<8x1xf32>
    %32 = vector.broadcast %31 : vector<8x1xf32> to vector<8x32xf32>
    %33 = arith.mulf %28, %32 : vector<8x32xf32>
    %34 = vector.broadcast %9 : vector<1x32xf32> to vector<8x32xf32>
    %35 = arith.mulf %33, %34 : vector<8x32xf32>
    %36 = vector.broadcast %10 : vector<1x32xf32> to vector<8x32xf32>
    %37 = arith.addf %35, %36 : vector<8x32xf32>
    %cst_14 = arith.constant dense<0.000000e+00> : vector<8x32xf32>
    %38 = tpu.matmul %37, %2, %cst_14 {dimension_numbers = #tpu.dot_dimension_numbers<[1], [0], [0], [1], [0, 0, 1, 1], [], []>} : vector<8x32xf32>, vector<32x32xf32>, vector<8x32xf32> -> vector<8x32xf32>
    %39 = arith.addf %0, %38 : vector<8x32xf32>
    %40 = vector.broadcast %13 : vector<1x32xf32> to vector<8x32xf32>
    %41 = arith.addf %39, %40 : vector<8x32xf32>
    %cst_15 = arith.constant dense<0.000000e+00> : vector<8xf32>
    %42 = vector.multi_reduction <add>, %41, %cst_15 [1] : vector<8x32xf32> to vector<8xf32>
    %43 = vector.shape_cast %42 : vector<8xf32> to vector<8x1xf32>
    %cst_16 = arith.constant 3.200000e+01 : f32
    %44 = vector.broadcast %cst_16 : f32 to vector<8x1xf32>
    %45 = arith.divf %43, %44 : vector<8x1xf32>
    %46 = vector.broadcast %45 : vector<8x1xf32> to vector<8x32xf32>
    %47 = arith.subf %41, %46 : vector<8x32xf32>
    %48 = arith.mulf %47, %47 : vector<8x32xf32>
    %cst_17 = arith.constant dense<0.000000e+00> : vector<8xf32>
    %49 = vector.multi_reduction <add>, %48, %cst_17 [1] : vector<8x32xf32> to vector<8xf32>
    %50 = vector.shape_cast %49 : vector<8xf32> to vector<8x1xf32>
    %cst_18 = arith.constant 3.200000e+01 : f32
    %51 = vector.broadcast %cst_18 : f32 to vector<8x1xf32>
    %52 = arith.divf %50, %51 : vector<8x1xf32>
    %53 = vector.broadcast %45 : vector<8x1xf32> to vector<8x32xf32>
    %54 = arith.subf %41, %53 : vector<8x32xf32>
    %cst_19 = arith.constant 9.99999974E-6 : f32
    %55 = vector.broadcast %cst_19 : f32 to vector<8x1xf32>
    %56 = arith.addf %52, %55 : vector<8x1xf32>
    %57 = math.rsqrt %56 : vector<8x1xf32>
    %58 = vector.broadcast %57 : vector<8x1xf32> to vector<8x32xf32>
    %59 = arith.mulf %54, %58 : vector<8x32xf32>
    %60 = vector.broadcast %11 : vector<1x32xf32> to vector<8x32xf32>
    %61 = arith.mulf %59, %60 : vector<8x32xf32>
    %62 = vector.broadcast %12 : vector<1x32xf32> to vector<8x32xf32>
    %63 = arith.addf %61, %62 : vector<8x32xf32>
    %cst_20 = arith.constant dense<0.000000e+00> : vector<8x64xf32>
    %64 = tpu.matmul %63, %4, %cst_20 {dimension_numbers = #tpu.dot_dimension_numbers<[1], [0], [0], [1], [0, 0, 1, 1], [], []>} : vector<8x32xf32>, vector<32x64xf32>, vector<8x64xf32> -> vector<8x64xf32>
    %65 = vector.broadcast %14 : vector<1x64xf32> to vector<8x64xf32>
    %66 = arith.addf %64, %65 : vector<8x64xf32>
    %cst_21 = arith.constant 5.000000e-01 : f32
    %67 = vector.broadcast %cst_21 : f32 to vector<8x64xf32>
    %68 = arith.mulf %67, %66 : vector<8x64xf32>
    %cst_22 = arith.constant 4.471500e-02 : f32
    %69 = vector.broadcast %cst_22 : f32 to vector<8x64xf32>
    %70 = arith.mulf %69, %66 : vector<8x64xf32>
    %71 = arith.mulf %70, %66 : vector<8x64xf32>
    %72 = arith.mulf %71, %66 : vector<8x64xf32>
    %73 = arith.addf %66, %72 : vector<8x64xf32>
    %cst_23 = arith.constant 0.797884583 : f32
    %74 = vector.broadcast %cst_23 : f32 to vector<8x64xf32>
    %75 = arith.mulf %74, %73 : vector<8x64xf32>
    %76 = math.tanh %75 : vector<8x64xf32>
    %cst_24 = arith.constant 1.000000e+00 : f32
    %77 = vector.broadcast %cst_24 : f32 to vector<8x64xf32>
    %78 = arith.addf %77, %76 : vector<8x64xf32>
    %79 = arith.mulf %68, %78 : vector<8x64xf32>
    %cst_25 = arith.constant dense<0.000000e+00> : vector<8x32xf32>
    %80 = tpu.matmul %79, %6, %cst_25 {dimension_numbers = #tpu.dot_dimension_numbers<[1], [0], [0], [1], [0, 0, 1, 1], [], []>} : vector<8x64xf32>, vector<64x32xf32>, vector<8x32xf32> -> vector<8x32xf32>
    %81 = arith.addf %41, %80 : vector<8x32xf32>
    %82 = vector.broadcast %15 : vector<1x32xf32> to vector<8x32xf32>
    %83 = arith.addf %81, %82 : vector<8x32xf32>
    %c1 = arith.constant 1 : index
    %c0_26 = arith.constant 0 : index
    %c0_27 = arith.constant 0 : index
    %84 = vector.load %arg1[%c1, %c0_26, %c0_27] : memref<2x136x128xf32, #tpu.memory_space<vmem>>, vector<1x32x32xf32>
    %85 = vector.shape_cast %84 : vector<1x32x32xf32> to vector<32x32xf32>
    %c1_28 = arith.constant 1 : index
    %c32_29 = arith.constant 32 : index
    %c0_30 = arith.constant 0 : index
    %86 = vector.load %arg1[%c1_28, %c32_29, %c0_30] : memref<2x136x128xf32, #tpu.memory_space<vmem>>, vector<1x32x64xf32>
    %87 = vector.shape_cast %86 : vector<1x32x64xf32> to vector<32x64xf32>
    %c1_31 = arith.constant 1 : index
    %c64_32 = arith.constant 64 : index
    %c0_33 = arith.constant 0 : index
    %88 = vector.load %arg1[%c1_31, %c64_32, %c0_33] : memref<2x136x128xf32, #tpu.memory_space<vmem>>, vector<1x64x32xf32>
    %89 = vector.shape_cast %88 : vector<1x64x32xf32> to vector<64x32xf32>
    %c1_34 = arith.constant 1 : index
    %c128_35 = arith.constant 128 : index
    %c0_36 = arith.constant 0 : index
    %90 = vector.load %arg1[%c1_34, %c128_35, %c0_36] : memref<2x136x128xf32, #tpu.memory_space<vmem>>, vector<1x8x128xf32>
    %91 = vector.shape_cast %90 : vector<1x8x128xf32> to vector<8x128xf32>
    %92 = vector.extract_strided_slice %91 {offsets = [0, 0], sizes = [1, 32], strides = [1, 1]} : vector<8x128xf32> to vector<1x32xf32>
    %93 = vector.extract_strided_slice %91 {offsets = [1, 0], sizes = [1, 32], strides = [1, 1]} : vector<8x128xf32> to vector<1x32xf32>
    %94 = vector.extract_strided_slice %91 {offsets = [2, 0], sizes = [1, 32], strides = [1, 1]} : vector<8x128xf32> to vector<1x32xf32>
    %95 = vector.extract_strided_slice %91 {offsets = [3, 0], sizes = [1, 32], strides = [1, 1]} : vector<8x128xf32> to vector<1x32xf32>
    %96 = vector.extract_strided_slice %91 {offsets = [4, 0], sizes = [1, 32], strides = [1, 1]} : vector<8x128xf32> to vector<1x32xf32>
    %97 = vector.extract_strided_slice %91 {offsets = [5, 0], sizes = [1, 64], strides = [1, 1]} : vector<8x128xf32> to vector<1x64xf32>
    %98 = vector.extract_strided_slice %91 {offsets = [6, 0], sizes = [1, 32], strides = [1, 1]} : vector<8x128xf32> to vector<1x32xf32>
    %cst_37 = arith.constant dense<0.000000e+00> : vector<8xf32>
    %99 = vector.multi_reduction <add>, %83, %cst_37 [1] : vector<8x32xf32> to vector<8xf32>
    %100 = vector.shape_cast %99 : vector<8xf32> to vector<8x1xf32>
    %cst_38 = arith.constant 3.200000e+01 : f32
    %101 = vector.broadcast %cst_38 : f32 to vector<8x1xf32>
    %102 = arith.divf %100, %101 : vector<8x1xf32>
    %103 = vector.broadcast %102 : vector<8x1xf32> to vector<8x32xf32>
    %104 = arith.subf %83, %103 : vector<8x32xf32>
    %105 = arith.mulf %104, %104 : vector<8x32xf32>
    %cst_39 = arith.constant dense<0.000000e+00> : vector<8xf32>
    %106 = vector.multi_reduction <add>, %105, %cst_39 [1] : vector<8x32xf32> to vector<8xf32>
    %107 = vector.shape_cast %106 : vector<8xf32> to vector<8x1xf32>
    %cst_40 = arith.constant 3.200000e+01 : f32
    %108 = vector.broadcast %cst_40 : f32 to vector<8x1xf32>
    %109 = arith.divf %107, %108 : vector<8x1xf32>
    %110 = vector.broadcast %102 : vector<8x1xf32> to vector<8x32xf32>
    %111 = arith.subf %83, %110 : vector<8x32xf32>
    %cst_41 = arith.constant 9.99999974E-6 : f32
    %112 = vector.broadcast %cst_41 : f32 to vector<8x1xf32>
    %113 = arith.addf %109, %112 : vector<8x1xf32>
    %114 = math.rsqrt %113 : vector<8x1xf32>
    %115 = vector.broadcast %114 : vector<8x1xf32> to vector<8x32xf32>
    %116 = arith.mulf %111, %115 : vector<8x32xf32>
    %117 = vector.broadcast %92 : vector<1x32xf32> to vector<8x32xf32>
    %118 = arith.mulf %116, %117 : vector<8x32xf32>
    %119 = vector.broadcast %93 : vector<1x32xf32> to vector<8x32xf32>
    %120 = arith.addf %118, %119 : vector<8x32xf32>
    %cst_42 = arith.constant dense<0.000000e+00> : vector<8x32xf32>
    %121 = tpu.matmul %120, %85, %cst_42 {dimension_numbers = #tpu.dot_dimension_numbers<[1], [0], [0], [1], [0, 0, 1, 1], [], []>} : vector<8x32xf32>, vector<32x32xf32>, vector<8x32xf32> -> vector<8x32xf32>
    %122 = arith.addf %83, %121 : vector<8x32xf32>
    %123 = vector.broadcast %96 : vector<1x32xf32> to vector<8x32xf32>
    %124 = arith.addf %122, %123 : vector<8x32xf32>
    %cst_43 = arith.constant dense<0.000000e+00> : vector<8xf32>
    %125 = vector.multi_reduction <add>, %124, %cst_43 [1] : vector<8x32xf32> to vector<8xf32>
    %126 = vector.shape_cast %125 : vector<8xf32> to vector<8x1xf32>
    %cst_44 = arith.constant 3.200000e+01 : f32
    %127 = vector.broadcast %cst_44 : f32 to vector<8x1xf32>
    %128 = arith.divf %126, %127 : vector<8x1xf32>
    %129 = vector.broadcast %128 : vector<8x1xf32> to vector<8x32xf32>
    %130 = arith.subf %124, %129 : vector<8x32xf32>
    %131 = arith.mulf %130, %130 : vector<8x32xf32>
    %cst_45 = arith.constant dense<0.000000e+00> : vector<8xf32>
    %132 = vector.multi_reduction <add>, %131, %cst_45 [1] : vector<8x32xf32> to vector<8xf32>
    %133 = vector.shape_cast %132 : vector<8xf32> to vector<8x1xf32>
    %cst_46 = arith.constant 3.200000e+01 : f32
    %134 = vector.broadcast %cst_46 : f32 to vector<8x1xf32>
    %135 = arith.divf %133, %134 : vector<8x1xf32>
    %136 = vector.broadcast %128 : vector<8x1xf32> to vector<8x32xf32>
    %137 = arith.subf %124, %136 : vector<8x32xf32>
    %cst_47 = arith.constant 9.99999974E-6 : f32
    %138 = vector.broadcast %cst_47 : f32 to vector<8x1xf32>
    %139 = arith.addf %135, %138 : vector<8x1xf32>
    %140 = math.rsqrt %139 : vector<8x1xf32>
    %141 = vector.broadcast %140 : vector<8x1xf32> to vector<8x32xf32>
    %142 = arith.mulf %137, %141 : vector<8x32xf32>
    %143 = vector.broadcast %94 : vector<1x32xf32> to vector<8x32xf32>
    %144 = arith.mulf %142, %143 : vector<8x32xf32>
    %145 = vector.broadcast %95 : vector<1x32xf32> to vector<8x32xf32>
    %146 = arith.addf %144, %145 : vector<8x32xf32>
    %cst_48 = arith.constant dense<0.000000e+00> : vector<8x64xf32>
    %147 = tpu.matmul %146, %87, %cst_48 {dimension_numbers = #tpu.dot_dimension_numbers<[1], [0], [0], [1], [0, 0, 1, 1], [], []>} : vector<8x32xf32>, vector<32x64xf32>, vector<8x64xf32> -> vector<8x64xf32>
    %148 = vector.broadcast %97 : vector<1x64xf32> to vector<8x64xf32>
    %149 = arith.addf %147, %148 : vector<8x64xf32>
    %cst_49 = arith.constant 5.000000e-01 : f32
    %150 = vector.broadcast %cst_49 : f32 to vector<8x64xf32>
    %151 = arith.mulf %150, %149 : vector<8x64xf32>
    %cst_50 = arith.constant 4.471500e-02 : f32
    %152 = vector.broadcast %cst_50 : f32 to vector<8x64xf32>
    %153 = arith.mulf %152, %149 : vector<8x64xf32>
    %154 = arith.mulf %153, %149 : vector<8x64xf32>
    %155 = arith.mulf %154, %149 : vector<8x64xf32>
    %156 = arith.addf %149, %155 : vector<8x64xf32>
    %cst_51 = arith.constant 0.797884583 : f32
    %157 = vector.broadcast %cst_51 : f32 to vector<8x64xf32>
    %158 = arith.mulf %157, %156 : vector<8x64xf32>
    %159 = math.tanh %158 : vector<8x64xf32>
    %cst_52 = arith.constant 1.000000e+00 : f32
    %160 = vector.broadcast %cst_52 : f32 to vector<8x64xf32>
    %161 = arith.addf %160, %159 : vector<8x64xf32>
    %162 = arith.mulf %151, %161 : vector<8x64xf32>
    %cst_53 = arith.constant dense<0.000000e+00> : vector<8x32xf32>
    %163 = tpu.matmul %162, %89, %cst_53 {dimension_numbers = #tpu.dot_dimension_numbers<[1], [0], [0], [1], [0, 0, 1, 1], [], []>} : vector<8x64xf32>, vector<64x32xf32>, vector<8x32xf32> -> vector<8x32xf32>
    %164 = arith.addf %124, %163 : vector<8x32xf32>
    %165 = vector.broadcast %98 : vector<1x32xf32> to vector<8x32xf32>
    %166 = arith.addf %164, %165 : vector<8x32xf32>
    %c0_54 = arith.constant 0 : index
    %c0_55 = arith.constant 0 : index
    %167 = vector.load %arg2[%c0_54, %c0_55] : memref<8x32xf32, #tpu.memory_space<vmem>>, vector<8x32xf32>
    tpu.vector_store %arg2[%c0_54, %c0_55], %166 {strides = array<i32>} : memref<8x32xf32, #tpu.memory_space<vmem>>, vector<8x32xf32>,
    return
  }
}

</mosaic_0001>

<bundles_post_ra>
// kernel: tpu_custom_call.1
= control target key start
LH: loop header
LB: loop body
LE: loop exit
PB: predicated region body
PF: predicated region fallthrough
CT: control target
= control target key end

     0   :  { %7 = vsyncpa [#allocation3], 0  ;;  %s1114_s0 = inlined_call_operand.hbm [shape: f32[8,32], index: 0, kind: input, shape index: {}]   ;;  %s1115_s1 = inlined_call_operand.hbm [shape: f32[2,136,128], index: 1, kind: input, shape index: {}]   ;;  %s1116_s2 = inlined_call_operand.hbm [shape: f32[8,32], index: 2, kind: output, shape index: {}]  }
   0x1   :  { %8 = vsyncpa [#allocation6], 0 }
   0x2   :  { %9 = vsyncpa [#allocation4], 0  ;;  %s940_s9 = smov [#allocation2]   ;;  %s941_s11 = smov [#allocation5]  }
   0x3   :  { %s16_s10 = sshll.u32 %s940_s9, 4  ;;  %s25_s12 = sshll.u32 %s941_s11, 4  ;;  %s17_s10 = int_to_ptr.vmem [resolvable:$true] %s16_s10  ;;  %s963_s12 = int_to_ptr.vmem [resolvable:$true] %s25_s12 }
   0x4   :  { %s868_s15 = scalar_lea.hbm %s1114_s0, 128 }
   0x5   :  { %p869_p0 = scmp.ne.s32.totalorder %s1114_s0, %s868_s15  ;;  %p872_p1 = scmp.lt.u32.totalorder %s868_s15, %s1114_s0 }
   0x7   :  { %p874_p2 = pnand %p872_p1, %p869_p0 }
   0x9   :  { %877 = shalt.err (!%p874_p2)
}
   0xa   :  { %s878_s20 = scalar_lea.vmem %s17_s10, 128  ;;  %p883_p4 = scmp.lt.s32.totalorder %s17_s10, %s17_s10 }
   0xb   :  { %p879_p3 = scmp.ne.s32.totalorder %s17_s10, %s878_s20  ;;  %p884_p5 = scmp.lt.s32.totalorder %s878_s20, %s878_s20 }
   0xd   :  { %p885_p6 = por %p884_p5, %p883_p4 }
   0xf   :  { %p886_p7 = pnand %p885_p6, %p879_p3 }
  0x11   :  { %889 = shalt.err (!%p886_p7)
}
  0x12   :  { %19 = dma.hbm_to_vmem [thread:$0]  %s1114_s0, 128, %s17_s10, [#allocation3]  }
  0x13   :  { %s890_s25 = scalar_lea.hbm %s1115_s1, 4352 }
  0x14   :  { %p891_p8 = scmp.ne.s32.totalorder %s1115_s1, %s890_s25  ;;  %p894_p9 = scmp.lt.u32.totalorder %s890_s25, %s1115_s1 }
  0x16   :  { %p896_p10 = pnand %p894_p9, %p891_p8 }
  0x18   :  { %899 = shalt.err (!%p896_p10)
}
  0x19   :  { %s900_s30 = scalar_lea.vmem %s963_s12, 4352  ;;  %p905_p12 = scmp.lt.s32.totalorder %s963_s12, %s963_s12 }
  0x1a   :  { %p901_p11 = scmp.ne.s32.totalorder %s963_s12, %s900_s30  ;;  %p906_p13 = scmp.lt.s32.totalorder %s900_s30, %s900_s30 }
  0x1c   :  { %p907_p0 = por %p906_p13, %p905_p12 }
  0x1e   :  { %p908_p1 = pnand %p907_p0, %p901_p11 }
  0x20   :  { %911 = shalt.err (!%p908_p1)
}
  0x21   :  { %s942_s0 = smov 128   ;;  %s943_s3 = smov 8  }
  0x22   :  { %31 = dma.hbm_to_vmem [thread:$0]  %s1115_s1, 4352, %s963_s12, [#allocation6], %s942_s0, %s942_s0, %s943_s3  }
  0x23   :  { %934 = dma.done.wait [#allocation3], 128  }
  0x24   :  { %935 = vsyncadd [#allocation3], 4294967168 }
  0x25   :  { %936 = dma.done.wait [#allocation6], 4352  }
  0x26   :  { %937 = vsyncadd [#allocation6], 4294962944  ;;  %vm56_vm0 = vcmask 261120   ;;  %v38_v0 = vld [vmem:[#allocation2] sm:$0xff]  ;;  %v39_v7 = vld [vmem:[#allocation5] sm:$0xff]  ;;  %v944_v10 = vmov 0.0|0.0   ;;  %v71_v17 = vlaneseq }
  0x27   :  { %v57_v1 = vsel %vm56_vm0, %v38_v0, 0.0  ;;  %v40_v8 = vld [vmem:[#allocation5 + $0x8] sm:$0xff]  ;;  %v41_v9 = vld [vmem:[#allocation5 + $0x10] sm:$0xff]  ;;  %800 = vmatprep.subr.bf16.mxu1 %v944_v10  ;;  %v42_v12 = vld [vmem:[#allocation5 + $0x18] sm:$0xff]  ;;  %vm945_vm1 = vmmov 0   ;;  %v946_v13 = vmov 0.0   ;;  %812 = vmatprep.subr.bf16.mxu0 %v944_v10 }
  0x28   :  { %58 = vadd.xlane.f32.xlu0 %v57_v1  ;;  %v801_v11 = vpack.c.bf16 %v40_v8, %v39_v7  ;;  %726 = vmatprep.mubr.msk.f32.mxu1 %vm945_vm1, %v946_v13  ;;  %v804_v14 = vpack.c.bf16 %v42_v12, %v41_v9  ;;  %v1004_v19 = vshrl.u32 %v71_v17, 7  ;;  %v1007_v21 = vld [vmem:[#allocation5 + $0x80] sm:$0xff]  ;;  %v44_v42 = vld [vmem:[#allocation5 + $0x28] sm:$0xff]  ;;  %v45_v44 = vld [vmem:[#allocation5 + $0x30] sm:$0xff]  ;;  %vm269_vm2 = vcmask 523264   ;;  %s947_s1 = smov [#allocation7]  }
  0x29   :  { %756 = vmatprep.mubr.msk.f32.mxu0 %vm945_vm1, %v946_v13  ;;  %v43_v41 = vld [vmem:[#allocation5 + $0x20] sm:$0xff]  ;;  %v46_v45 = vld [vmem:[#allocation5 + $0x38] sm:$0xff]  ;;  %v48_v59 = vld [vmem:[#allocation5 + $0x48] sm:$0xff]  ;;  %s664_s6 = sshll.u32 %s947_s1, 4  ;;  %s665_s6 = int_to_ptr.vmem [resolvable:$true] %s664_s6 }
  0x2a   :  { %802 = vmatpush3.bf16.msra.mxu1 %v801_v11  ;;  %v73_v20 = vsub.s32 0, %v1004_v19  ;;  %v78_v22 = vsub.s32 1, %v1004_v19  ;;  %v157_v29 = vsub.s32 4, %v1004_v19  ;;  %v807_v43 = vpack.c.bf16 %v44_v42, %v43_v41  ;;  %v47_v58 = vld [vmem:[#allocation5 + $0x40] sm:$0xff]  ;;  %v49_v60 = vld [vmem:[#allocation5 + $0x50] sm:$0xff]  ;;  %v50_v62 = vld [vmem:[#allocation5 + $0x58] sm:$0xff]  ;;  %p917_p3 = scmp.lt.s32.totalorder %s665_s6, %s665_s6 }
  0x2b   :  { %803 = vmatprep.subr.bf16.mxu1 %v944_v10  ;;  %v810_v46 = vpack.c.bf16 %v46_v45, %v45_v44  ;;  %v175_v50 = vsub.s32 2, %v1004_v19  ;;  %v180_v51 = vsub.s32 3, %v1004_v19  ;;  %v813_v61 = vpack.c.bf16 %v48_v59, %v47_v58  ;;  %v52_v1 = vld [vmem:[#allocation5 + $0x68] sm:$0xff]  ;;  %v351_v41 = vld [vmem:[#allocation5 + $0x90] sm:$0xff]  ;;  %s912_s7 = scalar_lea.vmem %s665_s6, 128 }
  0x2c   :  { %v74_v23 = vrot.slane %v1007_v21, %v73_v20  ;;  %v79_v26 = vrot.slane %v1007_v21, %v78_v22  ;;  %v158_v30 = vrot.slane %v1007_v21, %v157_v29  ;;  %v816_v63 = vpack.c.bf16 %v50_v62, %v49_v60  ;;  %p913_p2 = scmp.ne.s32.totalorder %s665_s6, %s912_s7  ;;  %p918_p4 = scmp.lt.s32.totalorder %s912_s7, %s912_s7 }
  0x2d   :  { %v176_v52 = vrot.slane %v1007_v21, %v175_v50  ;;  %v181_v55 = vrot.slane %v1007_v21, %v180_v51  ;;  %814 = vmatpush3.bf16.msra.mxu0 %v813_v61 }
  0x2e   :  { %805 = vmatpush3.bf16.msra.mxu1 %v804_v14  ;;  %815 = vmatprep.subr.bf16.mxu0 %v944_v10  ;;  %p919_p5 = por %p918_p4, %p917_p3 }
  0x2f   :  { %806 = vmatprep.subr.bf16.mxu1 %v944_v10 }
  0x30   :  { %p920_p6 = pnand %p919_p5, %p913_p2 }
  0x31   :  { %817 = vmatpush3.bf16.msra.mxu0 %v816_v63 }
  0x32   :  { %818 = vmatprep.subr.bf16.mxu0 %v944_v10 }
  0xb5   :  { %v59_v2 = vpop.xlane.xlu0 %58 }
  0xb6   :  { %v61_v3 = vmul.f32 0.03125, %v59_v2 }
  0xb8   :  { %v62_v4 = vsub.f32 %v38_v0, %v61_v3  ;;  %v53_v3 = vld [vmem:[#allocation5 + $0x70] sm:$0xff] }
  0xba   :  { %v63_v5 = vmul.f32 %v62_v4, %v62_v4 }
  0xbc   :  { %v64_v6 = vsel %vm56_vm0, %v63_v5, 0.0 }
  0xbd   :  { %65 = vadd.xlane.f32.xlu0 %v64_v6  ;;  %v185_v6 = vsub.s32 5, %v1004_v19 }
  0xbf   :  { %v186_v7 = vrot.slane %v1007_v21, %v185_v6 }
 0x14a   :  { %v66_v15 = vpop.xlane.xlu0 %65 }
 0x14b   :  { %v67_v16 = vmul.f32 0.03125, %v66_v15 }
 0x14d   :  { %v68_v18 = vadd.f32 1e-05, %v67_v16 }
 0x14f   :  { %856 = vrsqrt.f32 %v68_v18 }
 0x159   :  { %v857_v24 = vpop.eup %856 }
 0x15a   :  { %v70_v25 = vmul.f32 %v857_v24, %v62_v4  ;;  %v54_v4 = vld [vmem:[#allocation5 + $0x78] sm:$0xff] }
 0x15b   :  { %v822_v5 = vpack.c.bf16 %v54_v4, %v53_v3  ;;  %v357_v3 = vld [vmem:[#allocation5 + $0xc0] sm:$0xff] }
 0x15c   :  { %v75_v27 = vmul.f32 %v74_v23, %v70_v25 }
 0x15e   :  { %v80_v28 = vadd.f32 %v79_v26, %v75_v27  ;;  %v346_v26 = vsub.s32 6, %v1004_v19 }
 0x160   :  { %727 = vmatmul.mubr.msk.f32.vlgmr.msra.gmra.mrb[0].mxu1 %vm56_vm0, %v80_v28  ;;  %v347_v27 = vrot.slane %v1007_v21, %v346_v26  ;;  %v352_v21 = vld [vmem:[#allocation5 + $0x98] sm:$0xff] }
 0x161   :  { %737 = vmatprep.mubr.msk.f32.mxu1 %vm945_vm1, %v946_v13  ;;  %808 = vmatpush3.bf16.msra.mxu1 %v807_v43 }
 0x162   :  { %809 = vmatprep.subr.bf16.mxu1 %v944_v10 }
 0x165   :  { %811 = vmatpush3.bf16.msra.mxu1 %v810_v46 }
 0x166   :  { %824 = vmatprep.subr.bf16.mxu1 %v944_v10 }
 0x233   :  { %v150_v31 = vpop.f32.mrb[0].mxu1 }
 0x234   :  { %v154_v32 = vadd.f32 %v150_v31, %v38_v0  ;;  %v728_v33 = vpop.f32.mrb[1].mxu1  ;;  %v51_v0 = vld [vmem:[#allocation5 + $0x60] sm:$0xff] }
 0x235   :  { %v819_v2 = vpack.c.bf16 %v52_v1, %v51_v0  ;;  %v354_v0 = vld [vmem:[#allocation5 + $0xa8] sm:$0xff]  ;;  %v355_v1 = vld [vmem:[#allocation5 + $0xb0] sm:$0xff] }
 0x236   :  { %v1023_v34 = vadd.f32 %v158_v30, %v154_v32 }
 0x237   :  { %820 = vmatpush3.bf16.msra.mxu0 %v819_v2  ;;  %v356_v2 = vld [vmem:[#allocation5 + $0xb8] sm:$0xff] }
 0x238   :  { %v160_v35 = vsel %vm56_vm0, %v1023_v34, 0.0  ;;  %821 = vmatprep.subr.bf16.mxu0 %v944_v10  ;;  %v834_v4 = vpack.c.bf16 %v357_v3, %v356_v2 }
 0x239   :  { %161 = vadd.xlane.f32.xlu1 %v160_v35 }
 0x23b   :  { %823 = vmatpush3.bf16.msra.mxu0 %v822_v5 }
 0x23c   :  { %836 = vmatprep.subr.bf16.mxu0 %v944_v10 }
 0x2c6   :  { %v162_v36 = vpop.xlane.xlu1 %161 }
 0x2c7   :  { %v163_v37 = vmul.f32 0.03125, %v162_v36 }
 0x2c9   :  { %v164_v38 = vsub.f32 %v1023_v34, %v163_v37 }
 0x2cb   :  { %v165_v39 = vmul.f32 %v164_v38, %v164_v38 }
 0x2cd   :  { %v166_v40 = vsel %vm56_vm0, %v165_v39, 0.0 }
 0x2ce   :  { %167 = vadd.xlane.f32.xlu1 %v166_v40  ;;  %v350_v40 = vld [vmem:[#allocation5 + $0x88] sm:$0xff] }
 0x2cf   :  { %v825_v42 = vpack.c.bf16 %v351_v41, %v350_v40 }
 0x35b   :  { %v168_v47 = vpop.xlane.xlu1 %167 }
 0x35c   :  { %v169_v48 = vmul.f32 0.03125, %v168_v47  ;;  %v1062_v47 = vld [vmem:[#allocation5 + $0x108] sm:$0xff] }
 0x35e   :  { %v170_v49 = vadd.f32 1e-05, %v169_v48  ;;  %v383_v48 = vrot.slane %v1062_v47, %v73_v20 }
 0x360   :  { %858 = vrsqrt.f32 %v170_v49 }
 0x36a   :  { %v859_v53 = vpop.eup %858 }
 0x36b   :  { %v172_v54 = vmul.f32 %v859_v53, %v164_v38 }
 0x36d   :  { %v177_v56 = vmul.f32 %v176_v52, %v172_v54  ;;  %v388_v52 = vrot.slane %v1062_v47, %v78_v22 }
 0x36f   :  { %v182_v57 = vadd.f32 %v181_v55, %v177_v56  ;;  %v467_v56 = vrot.slane %v1062_v47, %v157_v29  ;;  %v831_v29 = vpack.c.bf16 %v355_v1, %v354_v0 }
 0x371   :  { %738 = vmatmul.mubr.msk.f32.vlgmr.msra.gmra.mrb[2].mxu1 %vm56_vm0, %v182_v57 }
 0x372   :  { %767 = vmatprep.mubr.msk.f32.mxu1 %vm945_vm1, %v946_v13  ;;  %826 = vmatpush3.bf16.msra.mxu1 %v825_v42 }
 0x373   :  { %827 = vmatprep.subr.bf16.mxu1 %v944_v10 }
 0x444   :  { %v256_v8 = vpop.f32.mrb[2].mxu1 }
 0x445   :  { %v257_v9 = vadd.f32 %v256_v8, %v186_v7  ;;  %v739_v11 = vpop.f32.mrb[3].mxu1 }
 0x447   :  { %v261_v12 = vmul.f32 0.044715, %v257_v9  ;;  %v260_v23 = vmul.f32 0.5, %v257_v9 }
 0x449   :  { %v262_v14 = vmul.f32 %v261_v12, %v257_v9 }
 0x44b   :  { %v263_v15 = vmul.f32 %v262_v14, %v257_v9  ;;  %v490_v14 = vrot.slane %v1062_v47, %v180_v51  ;;  %v364_v51 = vld [vmem:[#allocation5 + $0xf8] sm:$0xff] }
 0x44d   :  { %v264_v16 = vadd.f32 %v263_v15, %v257_v9  ;;  %v485_v9 = vrot.slane %v1062_v47, %v175_v50  ;;  %v362_v50 = vld [vmem:[#allocation5 + $0xe8] sm:$0xff] }
 0x44f   :  { %v265_v17 = vmul.f32 0.7978846, %v264_v16 }
 0x451   :  { %860 = vtanh.f32 %v265_v17  ;;  %v358_v17 = vld [vmem:[#allocation5 + $0xc8] sm:$0xff] }
 0x45b   :  { %v861_v18 = vpop.eup %860 }
 0x45c   :  { %v267_v24 = vadd.f32 1.0, %v861_v18  ;;  %v359_v18 = vld [vmem:[#allocation5 + $0xd0] sm:$0xff] }
 0x45e   :  { %v268_v25 = vmul.f32 %v267_v24, %v260_v23  ;;  %v837_v23 = vpack.c.bf16 %v359_v18, %v358_v17  ;;  %v360_v24 = vld [vmem:[#allocation5 + $0xd8] sm:$0xff] }
 0x460   :  { %757 = vmatmul.mubr.msk.f32.vlgmr.msra.gmra.mrb[0].mxu0 %vm269_vm2, %v268_v25  ;;  %v361_v25 = vld [vmem:[#allocation5 + $0xe0] sm:$0xff] }
 0x461   :  { %797 = vmatprep.mubr.msk.f32.mxu0 %vm945_vm1, %v946_v13  ;;  %838 = vmatpush3.bf16.msra.mxu0 %v837_v23 }
 0x462   :  { %839 = vmatprep.subr.bf16.mxu0 %v944_v10 }
 0x533   :  { %v339_v28 = vpop.f32.mrb[0].mxu0 }
 0x534   :  { %v343_v30 = vadd.f32 %v339_v28, %v1023_v34  ;;  %v758_v31 = vpop.f32.mrb[1].mxu0  ;;  %v353_v34 = vld [vmem:[#allocation5 + $0xa0] sm:$0xff]  ;;  %v363_v28 = vld [vmem:[#allocation5 + $0xf0] sm:$0xff] }
 0x535   :  { %v828_v43 = vpack.c.bf16 %v353_v34, %v352_v21  ;;  %v365_v31 = vld [vmem:[#allocation5 + $0x100] sm:$0xff] }
 0x536   :  { %v348_v32 = vadd.f32 %v347_v27, %v343_v30  ;;  %v840_v27 = vpack.c.bf16 %v361_v25, %v360_v24  ;;  %v843_v30 = vpack.c.bf16 %v363_v28, %v362_v50 }
 0x537   :  { %829 = vmatpush3.bf16.msra.mxu1 %v828_v43 }
 0x538   :  { %v367_v33 = vsel %vm56_vm0, %v348_v32, 0.0  ;;  %830 = vmatprep.subr.bf16.mxu1 %v944_v10  ;;  %841 = vmatpush3.bf16.msra.mxu0 %v840_v27 }
 0x539   :  { %368 = vadd.xlane.f32.xlu0 %v367_v33  ;;  %842 = vmatprep.subr.bf16.mxu0 %v944_v10  ;;  %v495_v33 = vrot.slane %v1062_v47, %v185_v6 }
 0x53c   :  { %844 = vmatpush3.bf16.msra.mxu0 %v843_v30 }
 0x53d   :  { %845 = vmatprep.subr.bf16.mxu0 %v944_v10 }
 0x5c6   :  { %v369_v35 = vpop.xlane.xlu0 %368 }
 0x5c7   :  { %v370_v36 = vmul.f32 0.03125, %v369_v35 }
 0x5c9   :  { %v371_v37 = vsub.f32 %v348_v32, %v370_v36 }
 0x5cb   :  { %v372_v38 = vmul.f32 %v371_v37, %v371_v37 }
 0x5cd   :  { %v373_v39 = vsel %vm56_vm0, %v372_v38, 0.0 }
 0x5ce   :  { %374 = vadd.xlane.f32.xlu1 %v373_v39 }
 0x65b   :  { %v375_v44 = vpop.xlane.xlu1 %374 }
 0x65c   :  { %v376_v45 = vmul.f32 0.03125, %v375_v44 }
 0x65e   :  { %v377_v46 = vadd.f32 1e-05, %v376_v45 }
 0x660   :  { %862 = vrsqrt.f32 %v377_v46 }
 0x66a   :  { %v863_v49 = vpop.eup %862 }
 0x66b   :  { %v379_v53 = vmul.f32 %v863_v49, %v371_v37 }
 0x66d   :  { %v384_v54 = vmul.f32 %v383_v48, %v379_v53 }
 0x66f   :  { %v389_v55 = vadd.f32 %v388_v52, %v384_v54 }
 0x671   :  { %768 = vmatmul.mubr.msk.f32.vlgmr.msra.gmra.mrb[4].mxu1 %vm56_vm0, %v389_v55 }
 0x672   :  { %778 = vmatprep.mubr.msk.f32.mxu1 %vm945_vm1, %v946_v13  ;;  %832 = vmatpush3.bf16.msra.mxu1 %v831_v29 }
 0x673   :  { %833 = vmatprep.subr.bf16.mxu1 %v944_v10  ;;  %v655_v10 = vrot.slane %v1062_v47, %v346_v26 }
 0x676   :  { %835 = vmatpush3.bf16.msra.mxu1 %v834_v4 }
 0x744   :  { %v459_v57 = vpop.f32.mrb[4].mxu1 }
 0x745   :  { %v463_v58 = vadd.f32 %v459_v57, %v348_v32  ;;  %v769_v20 = vpop.f32.mrb[5].mxu1  ;;  %v846_v32 = vpack.c.bf16 %v365_v31, %v364_v51 }
 0x747   :  { %v1076_v59 = vadd.f32 %v467_v56, %v463_v58  ;;  %847 = vmatpush3.bf16.msra.mxu0 %v846_v32 }
 0x749   :  { %v469_v22 = vsel %vm56_vm0, %v1076_v59, 0.0 }
 0x74a   :  { %470 = vadd.xlane.f32.xlu0 %v469_v22 }
 0x7d7   :  { %v471_v60 = vpop.xlane.xlu0 %470 }
 0x7d8   :  { %v472_v61 = vmul.f32 0.03125, %v471_v60 }
 0x7da   :  { %v473_v62 = vsub.f32 %v1076_v59, %v472_v61 }
 0x7dc   :  { %v474_v63 = vmul.f32 %v473_v62, %v473_v62 }
 0x7de   :  { %v475_v13 = vsel %vm56_vm0, %v474_v63, 0.0 }
 0x7df   :  { %476 = vadd.xlane.f32.xlu1 %v475_v13 }
 0x86c   :  { %v477_v5 = vpop.xlane.xlu1 %476 }
 0x86d   :  { %v478_v7 = vmul.f32 0.03125, %v477_v5 }
 0x86f   :  { %v479_v8 = vadd.f32 1e-05, %v478_v7 }
 0x871   :  { %864 = vrsqrt.f32 %v479_v8 }
 0x87b   :  { %v865_v11 = vpop.eup %864 }
 0x87c   :  { %v481_v12 = vmul.f32 %v865_v11, %v473_v62 }
 0x87e   :  { %v486_v15 = vmul.f32 %v485_v9, %v481_v12 }
 0x880   :  { %v491_v16 = vadd.f32 %v490_v14, %v486_v15 }
 0x882   :  { %779 = vmatmul.mubr.msk.f32.vlgmr.msra.gmra.mrb[6].mxu1 %vm56_vm0, %v491_v16 }
 0x955   :  { %v565_v35 = vpop.f32.mrb[6].mxu1 }
 0x956   :  { %v566_v36 = vadd.f32 %v565_v35, %v495_v33  ;;  %v780_v37 = vpop.f32.mrb[7].mxu1 }
 0x958   :  { %v570_v38 = vmul.f32 0.044715, %v566_v36  ;;  %v569_v34 = vmul.f32 0.5, %v566_v36 }
 0x95a   :  { %v571_v39 = vmul.f32 %v570_v38, %v566_v36 }
 0x95c   :  { %v572_v40 = vmul.f32 %v571_v39, %v566_v36 }
 0x95e   :  { %v573_v41 = vadd.f32 %v572_v40, %v566_v36 }
 0x960   :  { %v574_v42 = vmul.f32 0.7978846, %v573_v41 }
 0x962   :  { %866 = vtanh.f32 %v574_v42 }
 0x96c   :  { %v867_v21 = vpop.eup %866 }
 0x96d   :  { %v576_v43 = vadd.f32 1.0, %v867_v21 }
 0x96f   :  { %v577_v44 = vmul.f32 %v576_v43, %v569_v34 }
 0x971   :  { %798 = vmatmul.mubr.msk.f32.vlgmr.msra.gmra.mrb[2].mxu0 %vm269_vm2, %v577_v44 }
 0xa44   :  { %v647_v6 = vpop.f32.mrb[2].mxu0 }
 0xa45   :  { %v651_v45 = vadd.f32 %v647_v6, %v1076_v59  ;;  %v799_v46 = vpop.f32.mrb[3].mxu0 }
 0xa47   :  { %v656_v48 = vadd.f32 %v655_v10, %v651_v45 }
 0xa49   :  { %657 = vst.msk [vmem:[#allocation7] sm:$0xff] %vm56_vm0, %v656_v48 }
 0xa4a   :  { %923 = shalt.err (!%p920_p6)
}
 0xa4b   :  { %s924_s10 = scalar_lea.hbm %s1116_s2, 128 }
 0xa4c   :  { %p925_p7 = scmp.ne.s32.totalorder %s1116_s2, %s924_s10  ;;  %p928_p8 = scmp.lt.u32.totalorder %s924_s10, %s1116_s2 }
 0xa4e   :  { %p930_p9 = pnand %p928_p8, %p925_p7 }
 0xa50   :  { %933 = shalt.err (!%p930_p9)
}
 0xa51   :  { %667 = dma.vmem_to_hbm [thread:$0]  %s665_s6, 128, %s1116_s2, [#allocation4]  }
 0xa52   :  { %938 = dma.done.wait [#allocation4], 128  }
 0xa53   :  { %939 = vsyncadd [#allocation4], 4294967168 }
 0xa54   :  { %671 = vsyncpa [#allocation3], 1 }
 0xa55   :  { %672 = vsyncpa [#allocation6], 1 }
 0xa56   :  { %673 = vsyncpa [#allocation4], 1 }

</bundles_post_ra>
